<compile_context>
chip_gen: v6e
topology: v6e:2x2x1
jax: 0.10.0
libtpu: 0.0.40
codegen_flags: <defaults>
</compile_context>

<pallas_src>
import jax
import jax.numpy as jnp
from jax.experimental import pallas as pl
from jax.experimental.pallas import tpu as pltpu


def mlp_kernel(x_ref, w1_ref, b1_ref, w2_ref, b2_ref,
               w3_ref, b3_ref, w4_ref, b4_ref, o_ref):
    # x_ref: (9, TB) bf16 — batch on the lane axis (feature-major compute keeps
    # every intermediate and the final (1, TB) output lane-dense).
    # Layer 1: Linear(9->128) [BN folded] + ReLU (Dropout = identity in eval).
    h = jnp.dot(w1_ref[...], x_ref[...], preferred_element_type=jnp.float32)
    h = jnp.maximum(h + b1_ref[...], 0.0)                        # (128, TB) f32
    # Layer 2: Linear(128->64) [BN folded] + ReLU.
    h = jnp.dot(w2_ref[...], h.astype(jnp.bfloat16),
                preferred_element_type=jnp.float32)
    h = jnp.maximum(h + b2_ref[...], 0.0)                        # (64, TB) f32
    # Layer 3: Linear(64->32) [BN folded] + ReLU.
    h = jnp.dot(w3_ref[...], h.astype(jnp.bfloat16),
                preferred_element_type=jnp.float32)
    h = jnp.maximum(h + b3_ref[...], 0.0)                        # (32, TB) f32
    # Layer 4: Linear(32->1) as VPU multiply + sublane reduce (frees the MXU,
    # avoids a 1-lane-wide matmul result).  Scalar bias lives in SMEM.
    z = jnp.sum(h * w4_ref[...], axis=0, keepdims=True) + b4_ref[0, 0]  # (1,TB)
    # Exact sigmoid: z is only (1, TB), so the exact reciprocal is free and
    # keeps outputs in [0, 1].
    o_ref[...] = 1.0 / (1.0 + jnp.exp(-z))


def _round_up(n, m):
    return ((n + m - 1) // m) * m


def _resident(shape):
    # Whole array in VMEM; same block index every grid step -> stays resident.
    return pl.BlockSpec(shape, lambda i: (0,) * len(shape))


_TB_MAX = 8192    # max batch lanes per grid step (fits v7x 64 MiB VMEM easily)
_TB_ALIGN = 256   # whole 256-wide MXU N-streams on v6e/v7x (and >= lane tile)


def _choose_tb(B):
    """Adaptive batch tile: large (amortizes ~0.35 us/step overhead), aligned
    to 256, >=2 grid steps for dual-TC v7x when the batch allows, and tail
    padding bounded to < _TB_ALIGN * num_steps rows."""
    n_steps = pl.cdiv(B, _TB_MAX)
    if n_steps < 2 and B > _TB_ALIGN:
        n_steps = 2            # let dimension_semantics=("parallel",) shard
    return min(_TB_MAX, _round_up(pl.cdiv(B, n_steps), _TB_ALIGN))


@jax.jit
def loan_classify_forward(x, kp):
    """x: (B, 9) float. kp: dict from prepare_kernel_params. Returns (B, 1) f32."""
    B = x.shape[0]
    tb = _choose_tb(B)
    grid = (pl.cdiv(B, tb),)
    b_pad = grid[0] * tb

    # Feature-major view of x: batch on lanes, bf16 MXU operand.  Under jit
    # the transpose + cast fuse into one XLA op; the final partial batch tile
    # (when B % tb != 0) is handled by Pallas' implicit block padding — pad
    # lanes never mix with valid lanes and are sliced off at the end.
    # TODO(synk): optionally zero-pad the feature axis 9->16 for v5e packed
    # sublane DMA (few-% win); skipped to keep the wrapper to a single pass.
    xt = x.T.astype(jnp.bfloat16)                            # (9, B)

    in_specs = [
        pl.BlockSpec((9, tb), lambda i: (0, i)),             # x: pipelined
        _resident(kp["w1t"].shape),
        _resident(kp["b1"].shape),
        _resident(kp["w2t"].shape),
        _resident(kp["b2"].shape),
        _resident(kp["w3t"].shape),
        _resident(kp["b3"].shape),
        _resident(kp["w4c"].shape),
        pl.BlockSpec(memory_space=pltpu.MemorySpace.SMEM),   # b4 scalar
    ]
    out = pl.pallas_call(
        mlp_kernel,
        out_shape=jax.ShapeDtypeStruct((1, b_pad), jnp.float32),
        grid=grid,
        in_specs=in_specs,
        out_specs=pl.BlockSpec((1, tb), lambda i: (0, i)),   # lane-dense store
        compiler_params=pltpu.CompilerParams(
            dimension_semantics=("parallel",),
            vmem_limit_bytes=48 * 1024 * 1024),
    )(xt, kp["w1t"], kp["b1"], kp["w2t"], kp["b2"],
      kp["w3t"], kp["b3"], kp["w4c"], kp["b4"])
    return out[:, :B].T                                      # (B, 1)


def _torch_linear_init(key, fan_in, fan_out):
    """PyTorch nn.Linear default init: U(-1/sqrt(fan_in), 1/sqrt(fan_in))."""
    kw, kb = jax.random.split(key)
    bound = 1.0 / jnp.sqrt(float(fan_in))
    w = jax.random.uniform(kw, (fan_in, fan_out), jnp.float32, -bound, bound)
    b = jax.random.uniform(kb, (fan_out,), jnp.float32, -bound, bound)
    return w, b


def make_params(key):
    """f32 batch-major (in, out) weights with eval-mode BN folded in."""
    k1, k2, k3, k4 = jax.random.split(key, 4)
    w1, b1 = _torch_linear_init(k1, 9, 128)
    w2, b2 = _torch_linear_init(k2, 128, 64)
    w3, b3 = _torch_linear_init(k3, 64, 32)
    w4, b4 = _torch_linear_init(k4, 32, 1)

    eps = 1e-5

    def fold_bn(w, b, n):
        # Eval-mode BN with gamma=1, beta=0, running_mean=0, running_var=1.
        gamma = jnp.ones((n,), jnp.float32)
        beta = jnp.zeros((n,), jnp.float32)
        mean = jnp.zeros((n,), jnp.float32)
        var = jnp.ones((n,), jnp.float32)
        scale = gamma / jnp.sqrt(var + eps)
        shift = beta - mean * scale
        return w * scale[None, :], b * scale + shift

    w1, b1 = fold_bn(w1, b1, 128)
    w2, b2 = fold_bn(w2, b2, 64)
    w3, b3 = fold_bn(w3, b3, 32)
    # TODO(synk): training-mode BatchNorm (batch statistics) and stochastic
    # Dropout are not implemented; this kernel reproduces eval() semantics.
    return dict(w1=w1, b1=b1, w2=w2, b2=b2, w3=w3, b3=b3, w4=w4, b4=b4)


def prepare_kernel_params(p):
    """Feature-major layout; MXU operands bf16, VPU/bias terms f32."""
    return dict(
        w1t=p["w1"].T.astype(jnp.bfloat16),   # (128, 9)
        b1=p["b1"].reshape(128, 1),           # f32
        w2t=p["w2"].T.astype(jnp.bfloat16),   # (64, 128)
        b2=p["b2"].reshape(64, 1),
        w3t=p["w3"].T.astype(jnp.bfloat16),   # (32, 64)
        b3=p["b3"].reshape(32, 1),
        w4c=p["w4"].reshape(32, 1),           # f32 (VPU reduce path)
        b4=p["b4"].reshape(1, 1),             # f32 scalar -> SMEM
    )


def reference_forward(x, p):
    h = jnp.maximum(x @ p["w1"] + p["b1"], 0.0)
    h = jnp.maximum(h @ p["w2"] + p["b2"], 0.0)
    h = jnp.maximum(h @ p["w3"] + p["b3"], 0.0)
    return jax.nn.sigmoid(h @ p["w4"] + p["b4"])


if __name__ == "__main__":
    key = jax.random.PRNGKey(0)
    kx, kp = jax.random.split(key)
    B = 8
    x = jax.random.normal(kx, (B, 9), jnp.float32)
    params = make_params(kp)
    kparams = prepare_kernel_params(params)

    out = loan_classify_forward(x, kparams)
    out = jax.block_until_ready(out)

    ref = reference_forward(x, params)
    assert out.shape == (B, 1)
    # bf16 matmul operands => loose tolerance vs the full-f32 reference.
    assert jnp.allclose(out, ref, atol=3e-2, rtol=3e-2), float(
        jnp.max(jnp.abs(out - ref)))
    print("KERNEL_OK")
</pallas_src>

<mosaic_0001>
module attributes {stable_mosaic.version = 11 : i64} {
  func.func @mlp_kernel(%arg0: i32, %arg1: memref<9x256xbf16, #tpu.memory_space<vmem>>, %arg2: memref<128x9xbf16, #tpu.memory_space<vmem>>, %arg3: memref<128x1xf32, #tpu.memory_space<vmem>>, %arg4: memref<64x128xbf16, #tpu.memory_space<vmem>>, %arg5: memref<64x1xf32, #tpu.memory_space<vmem>>, %arg6: memref<32x64xbf16, #tpu.memory_space<vmem>>, %arg7: memref<32x1xf32, #tpu.memory_space<vmem>>, %arg8: memref<32x1xf32, #tpu.memory_space<vmem>>, %arg9: memref<1x1xf32, #tpu.memory_space<smem>>, %arg10: memref<1x256xf32, #tpu.memory_space<vmem>>) attributes {dimension_semantics = [#tpu.dimension_semantics<parallel>], iteration_bounds = array<i64: 1>, scalar_prefetch = 0 : i64, scratch_operands = 0 : i64, tpu.core_type = #tpu.core_type<tc>, window_params = [{transform_indices = @transform_0, window_bounds = array<i64: 9, 256>}, {pipeline_mode = #tpu.pipeline_mode<synchronous>, transform_indices = @transform_1, window_bounds = array<i64: 128, 9>}, {pipeline_mode = #tpu.pipeline_mode<synchronous>, transform_indices = @transform_2, window_bounds = array<i64: 128, 1>}, {pipeline_mode = #tpu.pipeline_mode<synchronous>, transform_indices = @transform_3, window_bounds = array<i64: 64, 128>}, {pipeline_mode = #tpu.pipeline_mode<synchronous>, transform_indices = @transform_4, window_bounds = array<i64: 64, 1>}, {pipeline_mode = #tpu.pipeline_mode<synchronous>, transform_indices = @transform_5, window_bounds = array<i64: 32, 64>}, {pipeline_mode = #tpu.pipeline_mode<synchronous>, transform_indices = @transform_6, window_bounds = array<i64: 32, 1>}, {pipeline_mode = #tpu.pipeline_mode<synchronous>, transform_indices = @transform_7, window_bounds = array<i64: 32, 1>}, {transform_indices = @transform_8, window_bounds = array<i64: 1, 1>}, {transform_indices = @transform_9, window_bounds = array<i64: 1, 256>}]} {
    %c0 = arith.constant 0 : index
    %c0_0 = arith.constant 0 : index
    %0 = vector.load %arg2[%c0, %c0_0] : memref<128x9xbf16, #tpu.memory_space<vmem>>, vector<128x9xbf16>
    %c0_1 = arith.constant 0 : index
    %c0_2 = arith.constant 0 : index
    %1 = vector.load %arg1[%c0_1, %c0_2] : memref<9x256xbf16, #tpu.memory_space<vmem>>, vector<9x256xbf16>
    %cst = arith.constant dense<0.000000e+00> : vector<128x256xf32>
    %2 = tpu.matmul %0, %1, %cst {dimension_numbers = #tpu.dot_dimension_numbers<[1], [0], [0], [1], [0, 0, 1, 1], [], []>} : vector<128x9xbf16>, vector<9x256xbf16>, vector<128x256xf32> -> vector<128x256xf32>
    %c0_3 = arith.constant 0 : index
    %c0_4 = arith.constant 0 : index
    %3 = vector.load %arg3[%c0_3, %c0_4] : memref<128x1xf32, #tpu.memory_space<vmem>>, vector<128x1xf32>
    %4 = vector.broadcast %3 : vector<128x1xf32> to vector<128x256xf32>
    %5 = arith.addf %2, %4 : vector<128x256xf32>
    %cst_5 = arith.constant 0.000000e+00 : f32
    %6 = vector.broadcast %cst_5 : f32 to vector<128x256xf32>
    %7 = arith.maximumf %5, %6 : vector<128x256xf32>
    %c0_6 = arith.constant 0 : index
    %c0_7 = arith.constant 0 : index
    %8 = vector.load %arg4[%c0_6, %c0_7] : memref<64x128xbf16, #tpu.memory_space<vmem>>, vector<64x128xbf16>
    %9 = arith.truncf %7 : vector<128x256xf32> to vector<128x256xbf16>
    %cst_8 = arith.constant dense<0.000000e+00> : vector<64x256xf32>
    %10 = tpu.matmul %8, %9, %cst_8 {dimension_numbers = #tpu.dot_dimension_numbers<[1], [0], [0], [1], [0, 0, 1, 1], [], []>} : vector<64x128xbf16>, vector<128x256xbf16>, vector<64x256xf32> -> vector<64x256xf32>
    %c0_9 = arith.constant 0 : index
    %c0_10 = arith.constant 0 : index
    %11 = vector.load %arg5[%c0_9, %c0_10] : memref<64x1xf32, #tpu.memory_space<vmem>>, vector<64x1xf32>
    %12 = vector.broadcast %11 : vector<64x1xf32> to vector<64x256xf32>
    %13 = arith.addf %10, %12 : vector<64x256xf32>
    %cst_11 = arith.constant 0.000000e+00 : f32
    %14 = vector.broadcast %cst_11 : f32 to vector<64x256xf32>
    %15 = arith.maximumf %13, %14 : vector<64x256xf32>
    %c0_12 = arith.constant 0 : index
    %c0_13 = arith.constant 0 : index
    %16 = vector.load %arg6[%c0_12, %c0_13] : memref<32x64xbf16, #tpu.memory_space<vmem>>, vector<32x64xbf16>
    %17 = arith.truncf %15 : vector<64x256xf32> to vector<64x256xbf16>
    %cst_14 = arith.constant dense<0.000000e+00> : vector<32x256xf32>
    %18 = tpu.matmul %16, %17, %cst_14 {dimension_numbers = #tpu.dot_dimension_numbers<[1], [0], [0], [1], [0, 0, 1, 1], [], []>} : vector<32x64xbf16>, vector<64x256xbf16>, vector<32x256xf32> -> vector<32x256xf32>
    %c0_15 = arith.constant 0 : index
    %c0_16 = arith.constant 0 : index
    %19 = vector.load %arg7[%c0_15, %c0_16] : memref<32x1xf32, #tpu.memory_space<vmem>>, vector<32x1xf32>
    %20 = vector.broadcast %19 : vector<32x1xf32> to vector<32x256xf32>
    %21 = arith.addf %18, %20 : vector<32x256xf32>
    %cst_17 = arith.constant 0.000000e+00 : f32
    %22 = vector.broadcast %cst_17 : f32 to vector<32x256xf32>
    %23 = arith.maximumf %21, %22 : vector<32x256xf32>
    %c0_18 = arith.constant 0 : index
    %c0_19 = arith.constant 0 : index
    %24 = vector.load %arg8[%c0_18, %c0_19] : memref<32x1xf32, #tpu.memory_space<vmem>>, vector<32x1xf32>
    %25 = vector.broadcast %24 : vector<32x1xf32> to vector<32x256xf32>
    %26 = arith.mulf %23, %25 : vector<32x256xf32>
    %cst_20 = arith.constant dense<0.000000e+00> : vector<256xf32>
    %27 = vector.multi_reduction <add>, %26, %cst_20 [0] : vector<32x256xf32> to vector<256xf32>
    %28 = vector.shape_cast %27 : vector<256xf32> to vector<1x256xf32>
    %c0_21 = arith.constant 0 : index
    %c0_22 = arith.constant 0 : index
    %29 = memref.load %arg9[%c0_21, %c0_22] : memref<1x1xf32, #tpu.memory_space<smem>>
    %30 = vector.broadcast %29 : f32 to vector<1x256xf32>
    %31 = arith.addf %28, %30 : vector<1x256xf32>
    %cst_23 = arith.constant 0.000000e+00 : f32
    %32 = vector.broadcast %cst_23 : f32 to vector<1x256xf32>
    %33 = arith.subf %32, %31 : vector<1x256xf32>
    %34 = math.exp %33 : vector<1x256xf32>
    %cst_24 = arith.constant 1.000000e+00 : f32
    %35 = vector.broadcast %cst_24 : f32 to vector<1x256xf32>
    %36 = arith.addf %35, %34 : vector<1x256xf32>
    %cst_25 = arith.constant 1.000000e+00 : f32
    %37 = vector.broadcast %cst_25 : f32 to vector<1x256xf32>
    %38 = arith.divf %37, %36 : vector<1x256xf32>
    %c0_26 = arith.constant 0 : index
    %c0_27 = arith.constant 0 : index
    %39 = vector.load %arg10[%c0_26, %c0_27] : memref<1x256xf32, #tpu.memory_space<vmem>>, vector<1x256xf32>
    tpu.vector_store %arg10[%c0_26, %c0_27], %38 {strides = array<i32>} : memref<1x256xf32, #tpu.memory_space<vmem>>, vector<1x256xf32>,
    return
  }
  func.func @transform_0(%arg0: i32) -> (i32, i32) {
    %c0_i32 = arith.constant 0 : i32
    %c0_i32_0 = arith.constant 0 : i32
    return %c0_i32, %arg0 : i32, i32
  }
  func.func @transform_1(%arg0: i32) -> (i32, i32) {
    %c0_i32 = arith.constant 0 : i32
    %c0_i32_0 = arith.constant 0 : i32
    %c0_i32_1 = arith.constant 0 : i32
    return %c0_i32, %c0_i32_0 : i32, i32
  }
  func.func @transform_2(%arg0: i32) -> (i32, i32) {
    %c0_i32 = arith.constant 0 : i32
    %c0_i32_0 = arith.constant 0 : i32
    %c0_i32_1 = arith.constant 0 : i32
    return %c0_i32, %c0_i32_0 : i32, i32
  }
  func.func @transform_3(%arg0: i32) -> (i32, i32) {
    %c0_i32 = arith.constant 0 : i32
    %c0_i32_0 = arith.constant 0 : i32
    %c0_i32_1 = arith.constant 0 : i32
    return %c0_i32, %c0_i32_0 : i32, i32
  }
  func.func @transform_4(%arg0: i32) -> (i32, i32) {
    %c0_i32 = arith.constant 0 : i32
    %c0_i32_0 = arith.constant 0 : i32
    %c0_i32_1 = arith.constant 0 : i32
    return %c0_i32, %c0_i32_0 : i32, i32
  }
  func.func @transform_5(%arg0: i32) -> (i32, i32) {
    %c0_i32 = arith.constant 0 : i32
    %c0_i32_0 = arith.constant 0 : i32
    %c0_i32_1 = arith.constant 0 : i32
    return %c0_i32, %c0_i32_0 : i32, i32
  }
  func.func @transform_6(%arg0: i32) -> (i32, i32) {
    %c0_i32 = arith.constant 0 : i32
    %c0_i32_0 = arith.constant 0 : i32
    %c0_i32_1 = arith.constant 0 : i32
    return %c0_i32, %c0_i32_0 : i32, i32
  }
  func.func @transform_7(%arg0: i32) -> (i32, i32) {
    %c0_i32 = arith.constant 0 : i32
    %c0_i32_0 = arith.constant 0 : i32
    %c0_i32_1 = arith.constant 0 : i32
    return %c0_i32, %c0_i32_0 : i32, i32
  }
  func.func @transform_8(%arg0: i32) -> (i32, i32) {
    %c0_i32 = arith.constant 0 : i32
    %c0_i32_0 = arith.constant 0 : i32
    %c0_i32_1 = arith.constant 0 : i32
    return %c0_i32, %c0_i32_0 : i32, i32
  }
  func.func @transform_9(%arg0: i32) -> (i32, i32) {
    %c0_i32 = arith.constant 0 : i32
    %c0_i32_0 = arith.constant 0 : i32
    return %c0_i32, %arg0 : i32, i32
  }
}

</mosaic_0001>

<bundles_post_ra>
// kernel: loan_classify_forward.1
= control target key start
LH: loop header
LB: loop body
LE: loop exit
PB: predicated region body
PF: predicated region fallthrough
CT: control target
= control target key end

     0   :  { %vm268_vm0 = vcmask 1043456   ;;  %v883_v2 = vmov 0   ;;  %vm269_vm1 = vcmask 1044480   ;;  %v884_v3 = vmov 65535   ;;  %s1185_s0 = inlined_call_operand.vmem [shape: bf16[9,8], index: 0, kind: input, shape index: {}]   ;;  %s1186_s1 = inlined_call_operand.vmem [shape: bf16[128,9], index: 1, kind: input, shape index: {}]   ;;  %s1187_s2 = inlined_call_operand.vmem [shape: f32[128,1], index: 2, kind: input, shape index: {}]   ;;  %s1188_s3 = inlined_call_operand.vmem [shape: bf16[64,128], index: 3, kind: input, shape index: {}]   ;;  %s1189_s4 = inlined_call_operand.vmem [shape: f32[64,1], index: 4, kind: input, shape index: {}]   ;;  %s1190_s5 = inlined_call_operand.vmem [shape: bf16[32,64], index: 5, kind: input, shape index: {}]   ;;  %s1191_s6 = inlined_call_operand.vmem [shape: f32[32,1], index: 6, kind: input, shape index: {}]   ;;  %s1192_s7 = inlined_call_operand.vmem [shape: f32[32,1], index: 7, kind: input, shape index: {}]   ;;  %s1193_s8 = inlined_call_operand.<no memory space> [shape: f32[1,1], index: 8, kind: input, shape index: {}]   ;;  %s1194_s9 = inlined_call_operand.vmem [shape: f32[1,256], index: 9, kind: output, shape index: {}]  }
   0x1   :  { %v33_v0 = vld [vmem:[%s1185_s0] sm:$0xf]  ;;  %v35_v1 = vld [vmem:[%s1185_s0 + $0x4] sm:$0xf]  ;;  %310 = vmatprep.mubr.bf16.mxu0 %v883_v2  ;;  %856 = vset.pattern.permute.xlu0 %v883_v2  ;;  %v270_v4 = vsel %vm268_vm0, 4294967295, %v884_v3  ;;  %v113_v6 = vld [vmem:[%s1187_s2 + $0x70] sm:$0xff] }
   0x2   :  { %34 = vst [vmem:[#allocation3] sm:$0xf] %v33_v0  ;;  %36 = vst [vmem:[#allocation3 + $0x8] sm:$0xf] %v35_v1  ;;  %857 = vset.pattern.permute.xlu1 %v883_v2  ;;  %551 = vmatprep.mubr.bf16.mxu1 %v883_v2  ;;  %v271_v5 = vsel %vm269_vm1, %v270_v4, 0  ;;  %v114_v7 = vld [vmem:[%s1187_s2 + $0x78] sm:$0xff] }
   0x3   :  { %v858_v8 = vld [vmem:[#allocation3 + $0x4] ss:$8 sps:$4 sm:$0x1f]   ;;  %187 = vperm.xlu0 %856, %v113_v6   ;;  %vm243_vm2 = vcmask 72704   ;;  %v109_v15 = vld [vmem:[%s1187_s2 + $0x50] sm:$0xff]  ;;  %v110_v16 = vld [vmem:[%s1187_s2 + $0x58] sm:$0xff] }
   0x4   :  { %v111_v10 = vld [vmem:[%s1187_s2 + $0x60] sm:$0xff]  ;;  %v276_v11 = vand.u32 %v858_v8, %v271_v5  ;;  %v112_v13 = vld [vmem:[%s1187_s2 + $0x68] sm:$0xff]  ;;  %v105_v20 = vld [vmem:[%s1187_s2 + $0x30] sm:$0xff]  ;;  %vm654_vm3 = vcmask 523264  }
   0x5   :  { %177 = vperm.xlu1 %857, %v111_v10   ;;  %v861_v14 = vld [vmem:[%s1186_s1] sm:$0xff]   ;;  %v108_v18 = vld [vmem:[%s1187_s2 + $0x48] sm:$0xff]  ;;  %v106_v21 = vld [vmem:[%s1187_s2 + $0x38] sm:$0xff] }
   0x6   :  { %292 = vmatprep.subr.bf16.mxu0 %v276_v11  ;;  %v107_v17 = vld [vmem:[%s1187_s2 + $0x40] sm:$0xff]  ;;  %v862_v19 = vld [vmem:[%s1186_s1 + $0x8] sm:$0xff]   ;;  %v863_v24 = vld [vmem:[%s1186_s1 + $0x10] sm:$0xff]  }
   0x7   :  { %192 = vperm.xlu0 %856, %v114_v7   ;;  %v103_v22 = vld [vmem:[%s1187_s2 + $0x20] sm:$0xff]  ;;  %v104_v23 = vld [vmem:[%s1187_s2 + $0x28] sm:$0xff]  ;;  %v101_v25 = vld [vmem:[%s1187_s2 + $0x10] sm:$0xff] }
   0x8   :  { %v102_v26 = vld [vmem:[%s1187_s2 + $0x18] sm:$0xff]  ;;  %v99_v27 = vld [vmem:[%s1187_s2] sm:$0xff]  ;;  %v100_v28 = vld [vmem:[%s1187_s2 + $0x8] sm:$0xff] }
   0x9   :  { %v860_v9 = vld [vmem:[#allocation3] ss:$8 sps:$4 sm:$0x1f]   ;;  %182 = vperm.xlu1 %857, %v112_v13   ;;  %v864_v29 = vld [vmem:[%s1186_s1 + $0x18] sm:$0xff]   ;;  %v453_v30 = vld [vmem:[%s1189_s4 + $0x30] sm:$0xff] }
   0xa   :  { %v273_v12 = vand.u32 %v860_v9, %v271_v5  ;;  %v454_v31 = vld [vmem:[%s1189_s4 + $0x38] sm:$0xff]  ;;  %v451_v32 = vld [vmem:[%s1189_s4 + $0x20] sm:$0xff]  ;;  %v452_v33 = vld [vmem:[%s1189_s4 + $0x28] sm:$0xff] }
   0xb   :  { %167 = vperm.xlu0 %856, %v109_v15   ;;  %v865_v34 = vld [vmem:[%s1186_s1 + $0x20] sm:$0xff]   ;;  %v449_v35 = vld [vmem:[%s1189_s4 + $0x10] sm:$0xff]  ;;  %v450_v36 = vld [vmem:[%s1189_s4 + $0x18] sm:$0xff] }
   0xc   :  { %293 = vmatpush1.bf16.msra.mxu0 %v273_v12  ;;  %v447_v37 = vld [vmem:[%s1189_s4] sm:$0xff]  ;;  %v448_v38 = vld [vmem:[%s1189_s4 + $0x8] sm:$0xff]  ;;  %v622_v42 = vld [vmem:[%s1191_s6 + $0x10] sm:$0xff] }
   0xd   :  { %172 = vperm.xlu1 %857, %v110_v16   ;;  %v866_v39 = vld [vmem:[%s1186_s1 + $0x28] sm:$0xff]   ;;  %v620_v40 = vld [vmem:[%s1191_s6] sm:$0xff]  ;;  %v623_v43 = vld [vmem:[%s1191_s6 + $0x18] sm:$0xff] }
   0xe   :  { %v621_v41 = vld [vmem:[%s1191_s6 + $0x8] sm:$0xff]  ;;  %v867_v44 = vld [vmem:[%s1186_s1 + $0x30] sm:$0xff]   ;;  %v722_v45 = vld [vmem:[%s1192_s7] sm:$0xff] }
   0xf   :  { %829 = vmatmul.mubr.msk.bf16.vlgmr.msra.gmra.mxu0 %vm243_vm2, %v861_v14  ;;  %157 = vperm.xlu0 %856, %v107_v17   ;;  %v723_v46 = vld [vmem:[%s1192_s7 + $0x8] sm:$0xff]  ;;  %v724_v47 = vld [vmem:[%s1192_s7 + $0x10] sm:$0xff]  ;;  %v725_v48 = vld [vmem:[%s1192_s7 + $0x18] sm:$0xff] }
  0x10   :  { %320 = vmatprep.mubr.bf16.mxu0 %v883_v2  ;;  %v868_v49 = vld [vmem:[%s1186_s1 + $0x38] sm:$0xff]  }
  0x11   :  { %162 = vperm.xlu1 %857, %v108_v18  }
  0x13   :  { %147 = vperm.xlu0 %856, %v105_v20  }
  0x15   :  { %152 = vperm.xlu1 %857, %v106_v21  }
  0x17   :  { %830 = vmatmul.mubr.msk.bf16.gmra.mxu0 %vm243_vm2, %v862_v19  ;;  %137 = vperm.xlu0 %856, %v103_v22  }
  0x18   :  { %330 = vmatprep.mubr.bf16.mxu0 %v883_v2 }
  0x19   :  { %142 = vperm.xlu1 %857, %v104_v23  }
  0x1b   :  { %127 = vperm.xlu0 %856, %v101_v25  }
  0x1d   :  { %132 = vperm.xlu1 %857, %v102_v26  }
  0x1f   :  { %831 = vmatmul.mubr.msk.bf16.gmra.mxu0 %vm243_vm2, %v863_v24  ;;  %117 = vperm.xlu0 %856, %v99_v27  }
  0x20   :  { %340 = vmatprep.mubr.bf16.mxu0 %v883_v2 }
  0x21   :  { %122 = vperm.xlu1 %857, %v100_v28  }
  0x23   :  { %487 = vperm.xlu0 %856, %v453_v30  }
  0x25   :  { %492 = vperm.xlu1 %857, %v454_v31  }
  0x27   :  { %832 = vmatmul.mubr.msk.bf16.gmra.mxu0 %vm243_vm2, %v864_v29  ;;  %477 = vperm.xlu0 %856, %v451_v32  }
  0x28   :  { %350 = vmatprep.mubr.bf16.mxu0 %v883_v2 }
  0x29   :  { %482 = vperm.xlu1 %857, %v452_v33  }
  0x2b   :  { %467 = vperm.xlu0 %856, %v449_v35  }
  0x2d   :  { %472 = vperm.xlu1 %857, %v450_v36  }
  0x2f   :  { %833 = vmatmul.mubr.msk.bf16.gmra.mxu0 %vm243_vm2, %v865_v34  ;;  %457 = vperm.xlu0 %856, %v447_v37  }
  0x30   :  { %360 = vmatprep.mubr.bf16.mxu0 %v883_v2 }
  0x31   :  { %462 = vperm.xlu1 %857, %v448_v38  }
  0x33   :  { %626 = vperm.xlu0 %856, %v620_v40  }
  0x35   :  { %631 = vperm.xlu1 %857, %v621_v41  }
  0x37   :  { %834 = vmatmul.mubr.msk.bf16.gmra.mxu0 %vm243_vm2, %v866_v39  ;;  %636 = vperm.xlu0 %856, %v622_v42  }
  0x38   :  { %370 = vmatprep.mubr.bf16.mxu0 %v883_v2 }
  0x39   :  { %641 = vperm.xlu1 %857, %v623_v43  }
  0x3b   :  { %728 = vperm.xlu0 %856, %v722_v45  }
  0x3d   :  { %733 = vperm.xlu1 %857, %v723_v46  }
  0x3f   :  { %835 = vmatmul.mubr.msk.bf16.gmra.mxu0 %vm243_vm2, %v867_v44  ;;  %738 = vperm.xlu0 %856, %v724_v47  }
  0x40   :  { %380 = vmatprep.mubr.bf16.mxu0 %v883_v2 }
  0x41   :  { %743 = vperm.xlu1 %857, %v725_v48  }
  0x47   :  { %836 = vmatmul.mubr.msk.bf16.gmra.mxu0 %vm243_vm2, %v868_v49 }
  0x48   :  { %693 = vmatprep.mubr.bf16.mxu0 %v883_v2 }
  0x7e   :  { %v1082_v50 = vpop.permute.xlu0 %187 }
  0x80   :  { %v1084_v51 = vpop.permute.xlu1 %177 }
  0x82   :  { %v1086_v52 = vpop.permute.xlu0 %192 }
  0x84   :  { %v1088_v53 = vpop.permute.xlu1 %182 }
  0x86   :  { %v1090_v54 = vpop.permute.xlu0 %167 }
  0x88   :  { %v1092_v55 = vpop.permute.xlu1 %172 }
  0x8a   :  { %v1094_v56 = vpop.permute.xlu0 %157 }
  0x8c   :  { %v1096_v57 = vpop.permute.xlu1 %162 }
  0x8e   :  { %v1098_v58 = vpop.permute.xlu0 %147 }
  0x90   :  { %v1100_v59 = vpop.permute.xlu1 %152 }
  0x92   :  { %v1102_v60 = vpop.permute.xlu0 %137 }
  0x94   :  { %v1104_v61 = vpop.permute.xlu1 %142 }
  0x96   :  { %v128_v62 = vpop.permute.xlu0 %127 }
  0x98   :  { %v133_v63 = vpop.permute.xlu1 %132 }
  0x9a   :  { %v118_v0 = vpop.permute.xlu0 %117 }
  0x9c   :  { %v123_v4 = vpop.permute.xlu1 %122 }
  0xcf   :  { %v312_v1 = vpop.f32.mrf.mxu0 }
  0xd0   :  { %v313_v5 = vadd.f32 %v312_v1, %v118_v0 }
  0xd1   :  { %v314_v3 = vpop.f32.mrf.mxu0 }
  0xd2   :  { %v315_v7 = vadd.f32 %v314_v3, %v118_v0  ;;  %v391_v10 = vmax.f32 %v313_v5, 0.0 }
  0xd3   :  { %v316_v6 = vpop.f32.mrf.mxu0 }
  0xd4   :  { %v317_v8 = vadd.f32 %v316_v6, %v123_v4  ;;  %v392_v14 = vmax.f32 %v315_v7, 0.0 }
  0xd5   :  { %v318_v9 = vpop.f32.mrf.mxu0 }
  0xd6   :  { %v393_v11 = vmax.f32 %v317_v8, 0.0  ;;  %v319_v12 = vadd.f32 %v318_v9, %v123_v4 }
  0xd7   :  { %v322_v13 = vpop.f32.mrf.mxu0 }
  0xd8   :  { %v1106_v15 = vpack.c.bf16 %v393_v11, %v391_v10  ;;  %v394_v16 = vmax.f32 %v319_v12, 0.0  ;;  %v323_v19 = vadd.f32 %v322_v13, %v128_v62 }
  0xd9   :  { %v324_v17 = vpop.f32.mrf.mxu0 }
  0xda   :  { %v1108_v18 = vpack.c.bf16 %v394_v16, %v392_v14  ;;  %v325_v21 = vadd.f32 %v324_v17, %v128_v62  ;;  %v395_v24 = vmax.f32 %v323_v19, 0.0 }
  0xdb   :  { %v326_v20 = vpop.f32.mrf.mxu0 }
  0xdc   :  { %v327_v22 = vadd.f32 %v326_v20, %v133_v63  ;;  %v396_v28 = vmax.f32 %v325_v21, 0.0 }
  0xdd   :  { %v328_v23 = vpop.f32.mrf.mxu0 }
  0xde   :  { %v397_v25 = vmax.f32 %v327_v22, 0.0  ;;  %v329_v26 = vadd.f32 %v328_v23, %v133_v63 }
  0xdf   :  { %v1110_v27 = vpop.f32.mrf.mxu0 }
  0xe0   :  { %v1112_v29 = vpack.c.bf16 %v397_v25, %v395_v24  ;;  %v398_v30 = vmax.f32 %v329_v26, 0.0 }
  0xe1   :  { %v1114_v31 = vpop.f32.mrf.mxu0 }
  0xe2   :  { %v1116_v32 = vpack.c.bf16 %v398_v30, %v396_v28 }
  0xe3   :  { %v1118_v33 = vpop.f32.mrf.mxu0 }
  0xe5   :  { %v1120_v34 = vpop.f32.mrf.mxu0 }
  0xe7   :  { %v1122_v35 = vpop.f32.mrf.mxu0 }
  0xe9   :  { %v344_v36 = vpop.f32.mrf.mxu0 }
  0xeb   :  { %v346_v37 = vpop.f32.mrf.mxu0 }
  0xed   :  { %v348_v38 = vpop.f32.mrf.mxu0 }
  0xef   :  { %v352_v39 = vpop.f32.mrf.mxu0 }
  0xf1   :  { %v354_v40 = vpop.f32.mrf.mxu0 }
  0xf3   :  { %v356_v41 = vpop.f32.mrf.mxu0 }
  0xf5   :  { %v358_v42 = vpop.f32.mrf.mxu0 }
  0xf7   :  { %v362_v43 = vpop.f32.mrf.mxu0 }
  0xf8   :  { %v363_v26 = vadd.f32 %v362_v43, %v1090_v54 }
  0xf9   :  { %v364_v44 = vpop.f32.mrf.mxu0 }
  0xfa   :  { %v365_v20 = vadd.f32 %v364_v44, %v1090_v54  ;;  %v357_v44 = vadd.f32 %v356_v41, %v1096_v57  ;;  %v345_v54 = vadd.f32 %v344_v36, %v1098_v58 }
  0xfb   :  { %v366_v45 = vpop.f32.mrf.mxu0 }
  0xfc   :  { %v367_v22 = vadd.f32 %v366_v45, %v1092_v55  ;;  %v412_v30 = vmax.f32 %v365_v20, 0.0  ;;  %v404_v36 = vmax.f32 %v345_v54, 0.0 }
  0xfd   :  { %v368_v46 = vpop.f32.mrf.mxu0 }
  0xfe   :  { %v369_v12 = vadd.f32 %v368_v46, %v1092_v55  ;;  %v413_v46 = vmax.f32 %v367_v22, 0.0  ;;  %v349_v55 = vadd.f32 %v348_v38, %v1100_v59  ;;  %v343_v38 = vadd.f32 %v1122_v35, %v1098_v58 }
  0xff   :  { %v372_v47 = vpop.f32.mrf.mxu0 }
 0x100   :  { %v373_v17 = vadd.f32 %v372_v47, %v1084_v51  ;;  %v406_v41 = vmax.f32 %v349_v55, 0.0 }
 0x101   :  { %v374_v48 = vpop.f32.mrf.mxu0 }
 0x102   :  { %v375_v8 = vadd.f32 %v374_v48, %v1084_v51  ;;  %v415_v28 = vmax.f32 %v373_v17, 0.0  ;;  %v355_v51 = vadd.f32 %v354_v40, %v1094_v56  ;;  %v347_v40 = vadd.f32 %v346_v37, %v1100_v59  ;;  %v488_v17 = vpop.permute.xlu0 %487 }
 0x103   :  { %v376_v49 = vpop.f32.mrf.mxu0  ;;  %v337_v59 = vadd.f32 %v1118_v33, %v1104_v61 }
 0x104   :  { %v377_v10 = vadd.f32 %v376_v49, %v1088_v53  ;;  %v416_v21 = vmax.f32 %v375_v8, 0.0  ;;  %v411_v49 = vmax.f32 %v363_v26, 0.0  ;;  %v408_v43 = vmax.f32 %v355_v51, 0.0 }
 0x105   :  { %v378_v62 = vpop.f32.mrf.mxu0  ;;  %v405_v37 = vmax.f32 %v347_v40, 0.0  ;;  %v401_v35 = vmax.f32 %v337_v59, 0.0 }
 0x106   :  { %v379_v3 = vadd.f32 %v378_v62, %v1088_v53  ;;  %v417_v23 = vmax.f32 %v377_v10, 0.0  ;;  %v414_v53 = vmax.f32 %v369_v12, 0.0  ;;  %v409_v62 = vmax.f32 %v357_v44, 0.0  ;;  %v478_v22 = vpop.permute.xlu0 %477 }
 0x107   :  { %v382_v63 = vpop.f32.mrf.mxu0 }
 0x108   :  { %v383_v6 = vadd.f32 %v382_v63, %v1082_v50  ;;  %v418_v13 = vmax.f32 %v379_v3, 0.0  ;;  %v443_v47 = vpack.c.bf16 %v417_v23, %v415_v28  ;;  %v442_v48 = vpack.c.bf16 %v414_v53, %v412_v30 }
 0x109   :  { %v384_v0 = vpop.f32.mrf.mxu0  ;;  %v441_v63 = vpack.c.bf16 %v413_v46, %v411_v49 }
 0x10a   :  { %v385_v4 = vadd.f32 %v384_v0, %v1082_v50  ;;  %v419_v19 = vmax.f32 %v383_v6, 0.0  ;;  %v444_v25 = vpack.c.bf16 %v418_v13, %v416_v21  ;;  %v468_v44 = vpop.permute.xlu0 %467 }
 0x10b   :  { %v386_v1 = vpop.f32.mrf.mxu0 }
 0x10c   :  { %v387_v5 = vadd.f32 %v386_v1, %v1086_v52  ;;  %v420_v14 = vmax.f32 %v385_v4, 0.0  ;;  %v438_v4 = vpack.c.bf16 %v406_v41, %v404_v36 }
 0x10d   :  { %v388_v7 = vpop.f32.mrf.mxu0 }
 0x10e   :  { %v389_v9 = vadd.f32 %v388_v7, %v1086_v52  ;;  %v421_v11 = vmax.f32 %v387_v5, 0.0  ;;  %v359_v52 = vadd.f32 %v358_v42, %v1096_v57  ;;  %v353_v42 = vadd.f32 %v352_v39, %v1094_v56  ;;  %v458_v36 = vpop.permute.xlu0 %457 }
 0x10f   :  { %v339_v57 = vadd.f32 %v1120_v34, %v1104_v61  ;;  %v335_v56 = vadd.f32 %v1114_v31, %v1102_v60  ;;  %v333_v34 = vadd.f32 %v1110_v27, %v1102_v60  ;;  %v403_v5 = vmax.f32 %v343_v38, 0.0  ;;  %v869_v60 = vld [vmem:[%s1188_s3] sm:$0xff]   ;;  %v870_v61 = vld [vmem:[%s1188_s3 + $0x8] sm:$0xff]  }
 0x110   :  { %v422_v16 = vmax.f32 %v389_v9, 0.0  ;;  %v445_v24 = vpack.c.bf16 %v421_v11, %v419_v19  ;;  %v410_v45 = vmax.f32 %v359_v52, 0.0  ;;  %v407_v1 = vmax.f32 %v353_v42, 0.0 }
 0x111   :  { %v402_v3 = vmax.f32 %v339_v57, 0.0  ;;  %v400_v58 = vmax.f32 %v335_v56, 0.0  ;;  %v437_v6 = vpack.c.bf16 %v405_v37, %v403_v5  ;;  %v399_v31 = vmax.f32 %v333_v34, 0.0 }
 0x112   :  { %v446_v50 = vpack.c.bf16 %v422_v16, %v420_v14  ;;  %v440_v0 = vpack.c.bf16 %v410_v45, %v408_v43  ;;  %v439_v39 = vpack.c.bf16 %v409_v62, %v407_v1  ;;  %v493_v14 = vpop.permute.xlu1 %492 }
 0x113   :  { %v436_v7 = vpack.c.bf16 %v402_v3, %v400_v58  ;;  %v435_v8 = vpack.c.bf16 %v401_v35, %v399_v31 }
 0x114   :  { %519 = vmatprep.subr.bf16.mxu1 %v446_v50 }
 0x115   :  { %520 = vmatpush1.bf16.msra.mxu1 %v445_v24 }
 0x116   :  { %521 = vmatprep.subr.bf16.mxu1 %v444_v25  ;;  %v483_v21 = vpop.permute.xlu1 %482 }
 0x119   :  { %522 = vmatpush1.bf16.msra.mxu1 %v443_v47 }
 0x11a   :  { %523 = vmatprep.subr.bf16.mxu1 %v442_v48  ;;  %v473_v25 = vpop.permute.xlu1 %472 }
 0x11d   :  { %524 = vmatpush1.bf16.msra.mxu1 %v441_v63 }
 0x11e   :  { %525 = vmatprep.subr.bf16.mxu1 %v440_v0  ;;  %v463_v63 = vpop.permute.xlu1 %462 }
 0x121   :  { %526 = vmatpush1.bf16.msra.mxu1 %v439_v39 }
 0x122   :  { %527 = vmatprep.subr.bf16.mxu1 %v438_v4 }
 0x125   :  { %528 = vmatpush1.bf16.msra.mxu1 %v437_v6 }
 0x126   :  { %529 = vmatprep.subr.bf16.mxu1 %v436_v7 }
 0x129   :  { %530 = vmatpush1.bf16.msra.mxu1 %v435_v8 }
 0x12a   :  { %531 = vmatprep.subr.bf16.mxu1 %v1116_v32 }
 0x12d   :  { %532 = vmatpush1.bf16.msra.mxu1 %v1112_v29 }
 0x12e   :  { %533 = vmatprep.subr.bf16.mxu1 %v1108_v18  ;;  %v871_v18 = vld [vmem:[%s1188_s3 + $0x10] sm:$0xff]  }
 0x131   :  { %534 = vmatpush1.bf16.msra.mxu1 %v1106_v15  ;;  %v872_v15 = vld [vmem:[%s1188_s3 + $0x18] sm:$0xff]  }
 0x134   :  { %552 = vmatmul.mubr.bf16.vlgmr.msra.gmra.mxu1 %v869_v60 }
 0x135   :  { %561 = vmatprep.mubr.bf16.mxu1 %v883_v2 }
 0x13c   :  { %562 = vmatmul.mubr.bf16.gmra.mxu1 %v870_v61 }
 0x13d   :  { %571 = vmatprep.mubr.bf16.mxu1 %v883_v2 }
 0x144   :  { %572 = vmatmul.mubr.bf16.gmra.mxu1 %v871_v18 }
 0x145   :  { %581 = vmatprep.mubr.bf16.mxu1 %v883_v2 }
 0x14c   :  { %582 = vmatmul.mubr.bf16.gmra.mxu1 %v872_v15 }
 0x14d   :  { %703 = vmatprep.mubr.bf16.mxu1 %v883_v2 }
 0x1f4   :  { %v553_v27 = vpop.f32.mrf.mxu1 }
 0x1f5   :  { %v554_v6 = vadd.f32 %v553_v27, %v458_v36  ;;  %v874_v27 = vld [vmem:[%s1190_s5 + $0x8] sm:$0xff]  }
 0x1f6   :  { %v555_v29 = vpop.f32.mrf.mxu1 }
 0x1f7   :  { %v556_v39 = vadd.f32 %v555_v29, %v458_v36  ;;  %v592_v18 = vmax.f32 %v554_v6, 0.0  ;;  %v873_v29 = vld [vmem:[%s1190_s5] sm:$0xff]  }
 0x1f8   :  { %v557_v32 = vpop.f32.mrf.mxu1 }
 0x1f9   :  { %v558_v4 = vadd.f32 %v557_v32, %v463_v63  ;;  %v593_v31 = vmax.f32 %v556_v39, 0.0  ;;  %v627_v32 = vpop.permute.xlu0 %626 }
 0x1fa   :  { %v559_v33 = vpop.f32.mrf.mxu1 }
 0x1fb   :  { %v560_v38 = vadd.f32 %v559_v33, %v463_v63  ;;  %v594_v8 = vmax.f32 %v558_v4, 0.0  ;;  %v632_v33 = vpop.permute.xlu1 %631 }
 0x1fc   :  { %v563_v9 = vpop.f32.mrf.mxu1 }
 0x1fd   :  { %v564_v59 = vadd.f32 %v563_v9, %v468_v44  ;;  %v595_v58 = vmax.f32 %v560_v38, 0.0  ;;  %v612_v15 = vpack.c.bf16 %v594_v8, %v592_v18  ;;  %v637_v9 = vpop.permute.xlu0 %636 }
 0x1fe   :  { %v565_v10 = vpop.f32.mrf.mxu1 }
 0x1ff   :  { %v566_v43 = vadd.f32 %v565_v10, %v468_v44  ;;  %v596_v7 = vmax.f32 %v564_v59, 0.0  ;;  %v613_v61 = vpack.c.bf16 %v595_v58, %v593_v31 }
 0x200   :  { %v567_v11 = vpop.f32.mrf.mxu1 }
 0x201   :  { %v568_v57 = vadd.f32 %v567_v11, %v473_v25  ;;  %v597_v3 = vmax.f32 %v566_v43, 0.0 }
 0x202   :  { %v569_v12 = vpop.f32.mrf.mxu1 }
 0x203   :  { %v570_v55 = vadd.f32 %v569_v12, %v473_v25  ;;  %v598_v34 = vmax.f32 %v568_v57, 0.0  ;;  %v642_v12 = vpop.permute.xlu1 %641 }
 0x204   :  { %v573_v13 = vpop.f32.mrf.mxu1 }
 0x205   :  { %v574_v49 = vadd.f32 %v573_v13, %v478_v22  ;;  %v599_v1 = vmax.f32 %v570_v55, 0.0  ;;  %v614_v60 = vpack.c.bf16 %v598_v34, %v596_v7  ;;  %v773_v7 = vstv %s1193_s8 }
 0x206   :  { %v575_v16 = vpop.f32.mrf.mxu1 }
 0x207   :  { %v576_v51 = vadd.f32 %v575_v16, %v478_v22  ;;  %v600_v37 = vmax.f32 %v574_v49, 0.0  ;;  %v615_v35 = vpack.c.bf16 %v599_v1, %v597_v3  ;;  %v734_v25 = vpop.permute.xlu1 %733 }
 0x208   :  { %v577_v19 = vpop.f32.mrf.mxu1 }
 0x209   :  { %v578_v46 = vadd.f32 %v577_v19, %v483_v21  ;;  %v601_v40 = vmax.f32 %v576_v51, 0.0 }
 0x20a   :  { %v579_v20 = vpop.f32.mrf.mxu1 }
 0x20b   :  { %v580_v2 = vadd.f32 %v579_v20, %v483_v21  ;;  %v602_v41 = vmax.f32 %v578_v46, 0.0  ;;  %v744_v63 = vpop.permute.xlu1 %743 }
 0x20c   :  { %v583_v50 = vpop.f32.mrf.mxu1 }
 0x20d   :  { %v584_v26 = vadd.f32 %v583_v50, %v488_v17  ;;  %v603_v45 = vmax.f32 %v580_v2, 0.0  ;;  %v616_v5 = vpack.c.bf16 %v602_v41, %v600_v37  ;;  %v729_v50 = vpop.permute.xlu0 %728 }
 0x20e   :  { %v585_v23 = vpop.f32.mrf.mxu1 }
 0x20f   :  { %v586_v52 = vadd.f32 %v585_v23, %v488_v17  ;;  %v604_v54 = vmax.f32 %v584_v26, 0.0  ;;  %v617_v56 = vpack.c.bf16 %v603_v45, %v601_v40 }
 0x210   :  { %v587_v24 = vpop.f32.mrf.mxu1 }
 0x211   :  { %v588_v53 = vadd.f32 %v587_v24, %v493_v14  ;;  %v605_v48 = vmax.f32 %v586_v52, 0.0 }
 0x212   :  { %v589_v28 = vpop.f32.mrf.mxu1 }
 0x213   :  { %v590_v30 = vadd.f32 %v589_v28, %v493_v14  ;;  %v606_v47 = vmax.f32 %v588_v53, 0.0 }
 0x215   :  { %v607_v42 = vmax.f32 %v590_v30, 0.0  ;;  %v618_v0 = vpack.c.bf16 %v606_v47, %v604_v54 }
 0x217   :  { %v619_v62 = vpack.c.bf16 %v607_v42, %v605_v48  ;;  %v739_v42 = vpop.permute.xlu0 %738 }
 0x219   :  { %669 = vmatprep.subr.bf16.mxu0 %v619_v62  ;;  %845 = vmatprep.subr.bf16.mxu1 %v619_v62 }
 0x21a   :  { %670 = vmatpush1.bf16.msra.mxu0 %v618_v0  ;;  %849 = vmatpush1.bf16.msra.mxu1 %v618_v0 }
 0x21b   :  { %671 = vmatprep.subr.bf16.mxu0 %v617_v56  ;;  %846 = vmatprep.subr.bf16.mxu1 %v617_v56 }
 0x21e   :  { %672 = vmatpush1.bf16.msra.mxu0 %v616_v5  ;;  %850 = vmatpush1.bf16.msra.mxu1 %v616_v5 }
 0x21f   :  { %673 = vmatprep.subr.bf16.mxu0 %v615_v35  ;;  %847 = vmatprep.subr.bf16.mxu1 %v615_v35 }
 0x222   :  { %674 = vmatpush1.bf16.msra.mxu0 %v614_v60  ;;  %851 = vmatpush1.bf16.msra.mxu1 %v614_v60 }
 0x223   :  { %675 = vmatprep.subr.bf16.mxu0 %v613_v61  ;;  %848 = vmatprep.subr.bf16.mxu1 %v613_v61 }
 0x226   :  { %676 = vmatpush1.bf16.msra.mxu0 %v612_v15  ;;  %852 = vmatpush1.bf16.msra.mxu1 %v612_v15 }
 0x229   :  { %843 = vmatmul.mubr.msk.bf16.vlgmr.msra.gmra.mxu0 %vm654_vm3, %v873_v29  ;;  %844 = vmatmul.mubr.msk.bf16.vlgmr.msra.gmra.mxu1 %vm654_vm3, %v874_v27 }
 0x2e9   :  { %v695_v10 = vpop.f32.mrf.mxu0  ;;  %v705_v11 = vpop.f32.mrf.mxu1 }
 0x2ea   :  { %v696_v13 = vadd.f32 %v695_v10, %v627_v32  ;;  %v706_v19 = vadd.f32 %v705_v11, %v637_v9 }
 0x2eb   :  { %v697_v14 = vpop.f32.mrf.mxu0  ;;  %v707_v16 = vpop.f32.mrf.mxu1 }
 0x2ec   :  { %v698_v17 = vadd.f32 %v697_v14, %v627_v32  ;;  %v708_v22 = vadd.f32 %v707_v16, %v637_v9  ;;  %v714_v23 = vmax.f32 %v696_v13, 0.0  ;;  %v718_v30 = vmax.f32 %v706_v19, 0.0 }
 0x2ed   :  { %v699_v20 = vpop.f32.mrf.mxu0  ;;  %v709_v21 = vpop.f32.mrf.mxu1  ;;  %v794_v14 = vlaneseq }
 0x2ee   :  { %v700_v24 = vadd.f32 %v699_v20, %v632_v33  ;;  %v710_v2 = vadd.f32 %v709_v21, %v642_v12  ;;  %v715_v26 = vmax.f32 %v698_v17, 0.0  ;;  %v719_v46 = vmax.f32 %v708_v22, 0.0 }
 0x2ef   :  { %v701_v52 = vpop.f32.mrf.mxu0  ;;  %v711_v53 = vpop.f32.mrf.mxu1  ;;  %v746_v55 = vmul.f32 %v729_v50, %v714_v23  ;;  %v750_v40 = vmul.f32 %v739_v42, %v718_v30  ;;  %v795_v17 = vshrl.u32 %v794_v14, 7  ;;  %vm808_vm4 = vcmp.lt.s32.totalorder %v794_v14, 256 }
 0x2f0   :  { %v702_v28 = vadd.f32 %v701_v52, %v632_v33  ;;  %v712_v51 = vadd.f32 %v711_v53, %v642_v12  ;;  %v716_v44 = vmax.f32 %v700_v24, 0.0  ;;  %v720_v48 = vmax.f32 %v710_v2, 0.0 }
 0x2f1   :  { %v747_v49 = vmul.f32 %v729_v50, %v715_v26  ;;  %v751_v57 = vmul.f32 %v739_v42, %v719_v46  ;;  %v885_v12 = vmov 1966171168  }
 0x2f2   :  { %v717_v47 = vmax.f32 %v702_v28, 0.0  ;;  %v748_v45 = vmul.f32 %v734_v25, %v716_v44  ;;  %v721_v43 = vmax.f32 %v712_v51, 0.0  ;;  %v752_v0 = vmul.f32 %v744_v63, %v720_v48 }
 0x2f3   :  { %v792_v13 = vunpack.c.l.s4 %v885_v12 }
 0x2f4   :  { %v749_v54 = vmul.f32 %v734_v25, %v717_v47  ;;  %v754_v62 = vadd.f32 %v748_v45, %v746_v55  ;;  %v753_v1 = vmul.f32 %v744_v63, %v721_v43 }
 0x2f5   :  { %v793_v16 = vunpack.c.0.s8 %v792_v13 }
 0x2f6   :  { %v763_v41 = vadd.f32 %v749_v54, %v747_v49  ;;  %v755_v38 = vadd.f32 %v754_v62, %v750_v40 }
 0x2f7   :  { %v796_v20 = vsub.s32 %v793_v16, %v795_v17 }
 0x2f8   :  { %v764_v56 = vadd.f32 %v763_v41, %v751_v57  ;;  %v756_v36 = vadd.f32 %v755_v38, %v752_v0 }
 0x2fa   :  { %v765_v59 = vadd.f32 %v764_v56, %v753_v1  ;;  %v757_v37 = vrot.slane %v756_v36, 4 }
 0x2fc   :  { %v766_v39 = vrot.slane %v765_v59, 4  ;;  %v758_v3 = vadd.f32 %v757_v37, %v756_v36 }
 0x2fe   :  { %v767_v4 = vadd.f32 %v766_v39, %v765_v59  ;;  %v759_v34 = vrot.slane %v758_v3, 2 }
 0x300   :  { %v768_v5 = vrot.slane %v767_v4, 2  ;;  %v760_v58 = vadd.f32 %v759_v34, %v758_v3 }
 0x302   :  { %v769_v35 = vadd.f32 %v768_v5, %v767_v4  ;;  %v761_v6 = vrot.slane %v760_v58, 1 }
 0x304   :  { %v770_v31 = vrot.slane %v769_v35, 1  ;;  %v762_v8 = vadd.f32 %v761_v6, %v760_v58 }
 0x306   :  { %v771_v60 = vadd.f32 %v770_v31, %v769_v35  ;;  %v774_v61 = vadd.f32 %v773_v7, %v762_v8 }
 0x308   :  { %v775_v18 = vadd.f32 %v773_v7, %v771_v60  ;;  %v776_v15 = vsub.f32 0.0, %v774_v61 }
 0x30a   :  { %v777_v29 = vsub.f32 0.0, %v775_v18  ;;  %v778_v27 = vmul.f32 1.442695, %v776_v15 }
 0x30c   :  { %v780_v32 = vmul.f32 1.442695, %v777_v29  ;;  %875 = vpow2.f32 %v778_v27 }
 0x30e   :  { %877 = vpow2.f32 %v780_v32 }
 0x319   :  { %v876_v33 = vpop.eup %875 }
 0x31a   :  { %v782_v10 = vadd.f32 1.0, %v876_v33 }
 0x31b   :  { %v878_v9 = vpop.eup %877 }
 0x31c   :  { %v783_v11 = vadd.f32 1.0, %v878_v9  ;;  %879 = vrcp.f32 %v782_v10 }
 0x31e   :  { %881 = vrcp.f32 %v783_v11 }
 0x329   :  { %v880_v19 = vpop.eup %879 }
 0x32b   :  { %v882_v21 = vpop.eup %881 }
 0x32c   :  { %v790_v50 = vcombine.low %v880_v19, %v882_v21 }
 0x32e   :  { %v797_v22 = vrot.slane %v790_v50, %v796_v20 }
 0x330   :  { %v804_v23 = vrot.slane %v797_v22, %v796_v20 }
 0x332   :  { %810 = vst.msk [vmem:[%s1194_s9] sm:$0x3] %vm808_vm4, %v804_v23 }

</bundles_post_ra>
